<compile_context>
chip_gen: v7x
topology: tpu7x:2x2x1
jax: 0.10.0
libtpu: 0.0.40
codegen_flags: <defaults>
</compile_context>

<pallas_src>
import functools

import jax
import jax.numpy as jnp
from jax.experimental import pallas as pl
from jax.experimental.pallas import tpu as pltpu


def _round_up(x, m):
    return (x + m - 1) // m * m


def _lsce_kernel(pred_ref, target_ref, out_ref, *, smoothing, n_total, tile_n):
    # pred_ref: (tile_n, C) float, target_ref: (tile_n, 1) int32,
    # out_ref: (8, 128) f32 per-tile partial-sum block.
    i = pl.program_id(0)

    pred = pred_ref[...].astype(jnp.float32)                        # (tile_n, C)
    tn, c = pred.shape

    # Row-wise stable logsumexp, row sum of logits, and the logit at the target.
    m = jnp.max(pred, axis=-1, keepdims=True)                       # (tile_n, 1)
    sum_exp = jnp.sum(jnp.exp(pred - m), axis=-1, keepdims=True)    # (tile_n, 1)
    lse = m + jnp.log(sum_exp)                                      # logsumexp per row
    sum_pred = jnp.sum(pred, axis=-1, keepdims=True)                # (tile_n, 1)

    cls_ids = jax.lax.broadcasted_iota(jnp.int32, (tn, c), 1)
    tgt = target_ref[...]                                           # (tile_n, 1)
    pred_t = jnp.sum(jnp.where(cls_ids == tgt, pred, 0.0),
                     axis=-1, keepdims=True)                        # (tile_n, 1)

    # Per-row loss without materializing weight / log_prob tensors.
    lp_t = pred_t - lse
    sum_lp = sum_pred - jnp.float32(c) * lse

    eps = jnp.float32(smoothing)
    off = jnp.float32(smoothing / (c - 1.0))
    row_loss = -(1.0 - eps) * lp_t - off * (sum_lp - lp_t)          # (tile_n, 1)

    # Mask rows past the true N (ragged last block reads unspecified data; the
    # select neutralizes any NaN/Inf there).  This mask must be kept.
    row_ids = i * tile_n + jax.lax.broadcasted_iota(jnp.int32, (tn, 1), 0)
    row_loss = jnp.where(row_ids < n_total, row_loss, 0.0)

    partial = jnp.sum(row_loss)
    # Broadcast the scalar across the aligned (8, 128) output block; the wrapper
    # reads element [0, 0] of each block, so no rounding is introduced.
    out_ref[...] = jnp.broadcast_to(partial, out_ref.shape).astype(out_ref.dtype)


def label_smoothing_cross_entropy(pred, target, smoothing=0.1, tile_n=None):
    """pred: (N, C) float array, target: (N,) int array -> scalar float32 loss."""
    n, c = pred.shape
    itemsize = jnp.dtype(pred.dtype).itemsize
    # Native sublane packing: 8 rows for f32, 16 for bf16, 32 for int8/fp8.
    sub = max(8, 32 // itemsize)
    n_ceil = _round_up(n, sub)

    if tile_n is None:
        # ~4 MiB of pred + target per tile (~8 MiB live with double buffering),
        # comfortably inside scoped VMEM on v5e/v6e and v7x (64 MiB physical).
        budget = 4 * 1024 * 1024
        # +512 B/row for the lane-padded (tile_n, 1) int32 target block in VMEM.
        tile_n = budget // (c * itemsize + 512)
    tile_n = max(sub, (min(int(tile_n), n_ceil) // sub) * sub)

    target2d = target.reshape(n, 1).astype(jnp.int32)

    g = pl.cdiv(n, tile_n)
    kernel = functools.partial(
        _lsce_kernel, smoothing=float(smoothing), n_total=n, tile_n=tile_n)

    cost = pl.CostEstimate(
        flops=6 * n * c,
        transcendentals=n * (c + 1),
        bytes_accessed=n * c * itemsize + n * 4 + g * 8 * 128 * 4,
    )

    out = pl.pallas_call(
        kernel,
        out_shape=jax.ShapeDtypeStruct((g * 8, 128), jnp.float32),
        grid_spec=pltpu.PrefetchScalarGridSpec(
            num_scalar_prefetch=0,
            grid=(g,),
            in_specs=[
                pl.BlockSpec((tile_n, c), lambda i: (i, 0)),
                pl.BlockSpec((tile_n, 1), lambda i: (i, 0)),
            ],
            out_specs=pl.BlockSpec((8, 128), lambda i: (i, 0)),
        ),
        compiler_params=pltpu.CompilerParams(
            dimension_semantics=("parallel",),
            vmem_limit_bytes=48 * 1024 * 1024,
        ),
        cost_estimate=cost,
    )(pred, target2d)

    partials = out.reshape(g, 8, 128)[:, 0, 0]                      # (g,)
    return jnp.sum(partials) / jnp.float32(n)


def _reference(pred, target, smoothing=0.1):
    # Pure-JAX reference matching the PyTorch module exactly.
    c = pred.shape[-1]
    log_prob = jax.nn.log_softmax(pred.astype(jnp.float32), axis=-1)
    weight = jnp.full(pred.shape, smoothing / (c - 1.0), dtype=jnp.float32)
    weight = weight.at[jnp.arange(pred.shape[0]), target].set(1.0 - smoothing)
    return jnp.mean(jnp.sum(-weight * log_prob, axis=-1))


if __name__ == "__main__":
    key = jax.random.PRNGKey(0)
    k_pred, k_tgt = jax.random.split(key)

    # N=20 rows over C=16 classes; tile_n=8 forces a 3-step grid with a ragged
    # (masked, un-padded) last tile to exercise the partial-block path.
    N, C = 20, 16
    pred = jax.random.normal(k_pred, (N, C), dtype=jnp.float32)
    target = jax.random.randint(k_tgt, (N,), 0, C, dtype=jnp.int32)

    loss = jax.block_until_ready(
        label_smoothing_cross_entropy(pred, target, smoothing=0.1, tile_n=8))
    ref = jax.block_until_ready(_reference(pred, target, smoothing=0.1))
    assert jnp.allclose(loss, ref, atol=1e-5, rtol=1e-5), (loss, ref)

    # Default (byte-budget) tile path on a second shape: single full block.
    N2, C2 = 8, 16
    pred2 = jax.random.normal(k_pred, (N2, C2), dtype=jnp.float32)
    target2 = jax.random.randint(k_tgt, (N2,), 0, C2, dtype=jnp.int32)
    loss2 = jax.block_until_ready(
        label_smoothing_cross_entropy(pred2, target2, smoothing=0.1))
    ref2 = jax.block_until_ready(_reference(pred2, target2, smoothing=0.1))
    assert jnp.allclose(loss2, ref2, atol=1e-5, rtol=1e-5), (loss2, ref2)

    # bf16 logits: exercises the 16-row sublane rounding and a ragged single block.
    N3, C3 = 20, 16
    pred3 = jax.random.normal(k_pred, (N3, C3), dtype=jnp.bfloat16)
    target3 = jax.random.randint(k_tgt, (N3,), 0, C3, dtype=jnp.int32)
    loss3 = jax.block_until_ready(
        label_smoothing_cross_entropy(pred3, target3, smoothing=0.1))
    ref3 = jax.block_until_ready(_reference(pred3, target3, smoothing=0.1))
    assert jnp.allclose(loss3, ref3, atol=1e-4, rtol=1e-4), (loss3, ref3)

    print("KERNEL_OK")
</pallas_src>

<mosaic_0001>
module attributes {stable_mosaic.version = 11 : i64} {
  func.func @_lsce_kernel(%arg0: i32, %arg1: memref<8x16xf32, #tpu.memory_space<vmem>>, %arg2: memref<8x1xi32, #tpu.memory_space<vmem>>, %arg3: memref<8x128xf32, #tpu.memory_space<vmem>>) attributes {dimension_semantics = [#tpu.dimension_semantics<parallel>], iteration_bounds = array<i64: 3>, scalar_prefetch = 0 : i64, scratch_operands = 0 : i64, tpu.core_type = #tpu.core_type<tc>, window_params = [{transform_indices = @transform_0, window_bounds = array<i64: 8, 16>}, {transform_indices = @transform_1, window_bounds = array<i64: 8, 1>}, {transform_indices = @transform_2, window_bounds = array<i64: 8, 128>}]} {
    %c0 = arith.constant 0 : index
    %c0_0 = arith.constant 0 : index
    %0 = vector.load %arg1[%c0, %c0_0] : memref<8x16xf32, #tpu.memory_space<vmem>>, vector<8x16xf32>
    %cst = arith.constant dense<0xFF800000> : vector<8xf32>
    %1 = vector.multi_reduction <maximumf>, %0, %cst [1] : vector<8x16xf32> to vector<8xf32>
    %2 = vector.shape_cast %1 : vector<8xf32> to vector<8x1xf32>
    %3 = vector.broadcast %2 : vector<8x1xf32> to vector<8x16xf32>
    %4 = arith.subf %0, %3 : vector<8x16xf32>
    %5 = math.exp %4 : vector<8x16xf32>
    %cst_1 = arith.constant dense<0.000000e+00> : vector<8xf32>
    %6 = vector.multi_reduction <add>, %5, %cst_1 [1] : vector<8x16xf32> to vector<8xf32>
    %7 = vector.shape_cast %6 : vector<8xf32> to vector<8x1xf32>
    %8 = math.log %7 : vector<8x1xf32>
    %9 = arith.addf %2, %8 : vector<8x1xf32>
    %cst_2 = arith.constant dense<0.000000e+00> : vector<8xf32>
    %10 = vector.multi_reduction <add>, %0, %cst_2 [1] : vector<8x16xf32> to vector<8xf32>
    %11 = vector.shape_cast %10 : vector<8xf32> to vector<8x1xf32>
    %12 = tpu.iota {dimensions = array<i32: 1>} : vector<8x16xi32>
    %c0_3 = arith.constant 0 : index
    %c0_4 = arith.constant 0 : index
    %13 = vector.load %arg2[%c0_3, %c0_4] : memref<8x1xi32, #tpu.memory_space<vmem>>, vector<8x1xi32>
    %14 = vector.broadcast %13 : vector<8x1xi32> to vector<8x16xi32>
    %15 = arith.cmpi eq, %12, %14 : vector<8x16xi32>
    %cst_5 = arith.constant 0.000000e+00 : f32
    %16 = vector.broadcast %cst_5 : f32 to vector<8x16xf32>
    %17 = arith.select %15, %0, %16 : vector<8x16xi1>, vector<8x16xf32>
    %cst_6 = arith.constant dense<0.000000e+00> : vector<8xf32>
    %18 = vector.multi_reduction <add>, %17, %cst_6 [1] : vector<8x16xf32> to vector<8xf32>
    %19 = vector.shape_cast %18 : vector<8xf32> to vector<8x1xf32>
    %20 = arith.subf %19, %9 : vector<8x1xf32>
    %cst_7 = arith.constant 1.600000e+01 : f32
    %21 = vector.broadcast %cst_7 : f32 to vector<8x1xf32>
    %22 = arith.mulf %21, %9 : vector<8x1xf32>
    %23 = arith.subf %11, %22 : vector<8x1xf32>
    %cst_8 = arith.constant 1.000000e+00 : f32
    %cst_9 = arith.constant 1.000000e-01 : f32
    %24 = arith.subf %cst_8, %cst_9 : f32
    %cst_10 = arith.constant 0.000000e+00 : f32
    %25 = arith.subf %cst_10, %24 : f32
    %26 = vector.broadcast %25 : f32 to vector<8x1xf32>
    %27 = arith.mulf %26, %20 : vector<8x1xf32>
    %28 = arith.subf %23, %20 : vector<8x1xf32>
    %cst_11 = arith.constant 0.00666666683 : f32
    %29 = vector.broadcast %cst_11 : f32 to vector<8x1xf32>
    %30 = arith.mulf %29, %28 : vector<8x1xf32>
    %31 = arith.subf %27, %30 : vector<8x1xf32>
    %c8_i32 = arith.constant 8 : i32
    %32 = arith.muli %arg0, %c8_i32 : i32
    %33 = tpu.iota {dimensions = array<i32: 0>} : vector<8x1xi32>
    %34 = vector.broadcast %32 : i32 to vector<8x1xi32>
    %35 = arith.addi %34, %33 : vector<8x1xi32>
    %c20_i32 = arith.constant 20 : i32
    %36 = vector.broadcast %c20_i32 : i32 to vector<8x1xi32>
    %37 = arith.cmpi slt, %35, %36 : vector<8x1xi32>
    %cst_12 = arith.constant 0.000000e+00 : f32
    %38 = vector.broadcast %cst_12 : f32 to vector<8x1xf32>
    %39 = arith.select %37, %31, %38 : vector<8x1xi1>, vector<8x1xf32>
    %40 = vector.shape_cast %39 : vector<8x1xf32> to vector<1x8x1xf32>
    %cst_13 = arith.constant dense<0.000000e+00> : vector<1xf32>
    %41 = vector.multi_reduction <add>, %40, %cst_13 [1, 2] : vector<1x8x1xf32> to vector<1xf32>
    %42 = vector.shape_cast %41 : vector<1xf32> to vector<1x1x1xf32>
    %43 = vector.extract %42[0, 0, 0] : f32 from vector<1x1x1xf32>
    %44 = vector.broadcast %43 : f32 to vector<8x128xf32>
    %c0_14 = arith.constant 0 : index
    %c0_15 = arith.constant 0 : index
    %45 = vector.load %arg3[%c0_14, %c0_15] : memref<8x128xf32, #tpu.memory_space<vmem>>, vector<8x128xf32>
    tpu.vector_store %arg3[%c0_14, %c0_15], %44 {strides = array<i32>} : memref<8x128xf32, #tpu.memory_space<vmem>>, vector<8x128xf32>,
    return
  }
  func.func @transform_0(%arg0: i32) -> (i32, i32) {
    %c0_i32 = arith.constant 0 : i32
    %c0_i32_0 = arith.constant 0 : i32
    return %arg0, %c0_i32 : i32, i32
  }
  func.func @transform_1(%arg0: i32) -> (i32, i32) {
    %c0_i32 = arith.constant 0 : i32
    %c0_i32_0 = arith.constant 0 : i32
    return %arg0, %c0_i32 : i32, i32
  }
  func.func @transform_2(%arg0: i32) -> (i32, i32) {
    %c0_i32 = arith.constant 0 : i32
    %c0_i32_0 = arith.constant 0 : i32
    return %arg0, %c0_i32 : i32, i32
  }
}

</mosaic_0001>

<bundles_post_ra>
// kernel: tpu_custom_call.1
= control target key start
LH: loop header
LB: loop body
LE: loop exit
PB: predicated region body
PF: predicated region fallthrough
CT: control target
= control target key end

     0   :  { %7 = vsyncpa [#allocation3], 0  ;;  %s544_s0 = inlined_call_operand.vmem [shape: f32[20,16], index: 0, kind: input, shape index: {}]   ;;  %s545_s1 = inlined_call_operand.vmem [shape: s32[20,1], index: 1, kind: input, shape index: {}]   ;;  %s546_s2 = inlined_call_operand.hbm [shape: f32[24,128], index: 2, kind: output, shape index: {}]  }
   0x1   :  { %9 = vsyncpa [#allocation3 + $0x1], 0  ;;  %s436_s9 = smov 0   ;;  %s438_s10 = smov 0  }
   0x2   :  { %s440_s11 = smov 0   ;;  %s442_s12 = smov 0  }
   0x3 LB: > { %s457_s13 = sadd.s32 4294967295, %s417_s12   ;;  %s296_s14 = sadd.s32 4294967294, %s417_s12   ;;  %s417_s12 = sphi %s442_s12, %s552_s12   ;;  %s413_s11 = sphi %s440_s11, %s551_s11   ;;  %s409_s10 = sphi %s438_s10, %s550_s10   ;;  %s405_s9 = sphi %s436_s9, %s549_s9  }
   0x4   : > { %s461_s15 = sadd.s32 1, %s417_s12   ;;  %s74_s16 = sadd.s32 1, %s413_s11 }
   0x5   : > { %s71_s17 = ssub.s32 %s417_s12, %s461_s15  ;;  %p84_p0 = scmp.ne.s32.totalorder %s413_s11, %s409_s10 }
   0x6   : > { %p72_p1 = scmp.eq.s32.totalorder %s71_s17, 0  ;;  %p85_p2 = scmp.eq.s32.totalorder %s457_s13, 2 }
   0x7   : > { %p90_p3 = scmp.ne.s32.totalorder %s409_s10, %s405_s9  ;;  %p91_p4 = scmp.eq.s32.totalorder %s296_s14, 2 }
   0x8   : > { %s472_s18 = scalar_select %p72_p1, %s413_s11, %s74_s16  }
   0x9   : > { %p474_p5 = por %p85_p2, %p84_p0  ;;  %p478_p6 = por %p91_p4, %p90_p3 }
   0xa   : > { %p299_p7 = scmp.ge.s32.totalorder %s417_s12, 1  ;;  %p123_p8 = scmp.lt.s32.totalorder %s417_s12, 4 }
   0xc   : > { %p124_p9 = pnand %p299_p7, %p123_p8 }
   0xd   : > { %p148_p10 = scmp.lt.s32.totalorder (!%p124_p9), %s457_s13, 2  ;;  %v419_v0 = vmov (!%p124_p9), 0   ;;  %vm157_vm0 = vcmask (!%p124_p9), 130048   ;;  %v173_v7 = vlaneseq (!%p124_p9)  ;;  %s303_s29 = sshll.u32 (!%p124_p9), %s457_s13, 3  ;;  %vm198_vm3 = vcmask (!%p124_p9), 7168  }
   0xe   : > { %127 = sbr.rel (%p124_p9) target bundleno = 573 (0x23d), region = 28  ;;  %350 = vset.pattern.permute.xlu0 (!%p124_p9), %v419_v0  ;;  %v194_v23 = vstv (!%p124_p9), %s303_s29  ;;  %s145_s30 = sand.u32 (!%p124_p9), 1, %s409_s10  }
   0xf   : > { %v174_v8 = vand.u32 (!%p124_p9), 127, %v173_v7  ;;  %v193_v21 = vshrl.u32 (!%p124_p9), %v173_v7, 7  ;;  %s300_s3 = sshll.u32 (!%p124_p9), %s145_s30, 3  ;;  %s305_s6 = sshll.u32 (!%p124_p9), %s457_s13, 7 }
  0x10   : > { %s147_s4 = scalar_lea.vmem (!%p124_p9), [#allocation2], %s300_s3  ;;  %s504_s16 = scalar_lea.hbm (!%p124_p9), %s546_s2, %s305_s6 }
  0x11   : > { %v195_v26 = vadd.s32 (!%p124_p9), %v194_v23, %v193_v21  ;;  %s225_s5 = sshll.u32 (!%p124_p9), %s147_s4, 4  ;;  %s212_s17 = scalar_lea.sflag (!%p124_p9), [#allocation3], %s145_s30  ;;  %s499_s5 = int_to_ptr.vmem [resolvable:$true] %s225_s5 }
  0x13   : > { %vm196_vm2 = vcmp.lt.s32.totalorder (!%p124_p9), %v195_v26, 20 }
  0x15   : > { %s149_s21 = scalar_select %p148_p10, %s457_s13, 2 }
  0x16   : > { %s420_s13 = smov [#allocation2]  }
  0x17   : > { %s301_s22 = sshll.u32 %s149_s21, 3  ;;  %s355_s21 = scalar_lea.vmem %s499_s5, 128 }
  0x18   : > { %s151_s25 = scalar_lea.vmem %s544_s0, %s301_s22  ;;  %s155_s28 = scalar_lea.vmem %s545_s1, %s301_s22 }
  0x19   : > { %v156_v1 = vld [vmem:[%s151_s25] sm:$0xff]  ;;  %p356_p11 = scmp.ne.s32.totalorder %s499_s5, %s355_s21  ;;  %s359_s22 = sshll.u32 %s420_s13, 4  ;;  %s360_s22 = int_to_ptr.vmem [resolvable:$false] %s359_s22 }
  0x1a   : > { %v158_v2 = vsel %vm157_vm0, %v156_v1, -inf  ;;  %v175_v3 = vld [vmem:[%s155_s28] sm:$0xff]  ;;  %v170_v12 = vsel %vm157_vm0, %v156_v1, 0.0  ;;  %s361_s23 = scalar_lea.vmem %s360_s22, 256  ;;  %p362_p0 = scmp.lt.s32.totalorder %s499_s5, %s360_s22 }
  0x1b   : > { %159 = vmax.xlane.f32.xlu0 %v158_v2  ;;  %p357_p12 = pnand %p356_p11, %p474_p5  ;;  %p363_p1 = scmp.lt.s32.totalorder %s361_s23, %s355_s21 }
  0x1d   : > { %p358_p13 = pneg %p357_p12  ;;  %p364_p2 = por %p363_p1, %p362_p0 }
  0x1f   : > { %p365_p3 = pnand %p364_p2, %p358_p13 }
  0x31   : > { %177 = vperm.xlu0 %350, %v175_v3  }
  0xa8   : > { %v160_v4 = vpop.xlane.xlu0 %159 }
  0xa9   : > { %v161_v5 = vsub.f32 %v156_v1, %v160_v4 }
  0xab   : > { %v162_v6 = vmul.f32 1.442695, %v161_v5 }
  0xad   : > { %351 = vpow2.f32 %v162_v6 }
  0xb0   : > { %v178_v9 = vpop.permute.xlu0 %177 }
  0xb1   : > { %vm179_vm1 = vcmp.eq.s32.totalorder %v174_v8, %v178_v9 }
  0xb2   : > { %v180_v13 = vsel %vm179_vm1, %v156_v1, 0.0 }
  0xb3   : > { %v181_v14 = vsel %vm157_vm0, %v180_v13, 0.0 }
  0xb7   : > { %v352_v10 = vpop.eup %351 }
  0xb8   : > { %v164_v11 = vsel %vm157_vm0, %v352_v10, 0.0 }
  0xb9   : > { %165 = vadd.xlane.f32.xlu1 %v164_v11 }
  0xbd   : > { %171 = vadd.xlane.f32.xlu1 %v170_v12 }
  0xc1   : > { %182 = vadd.xlane.f32.xlu1 %v181_v14 }
 0x146   : > { %v166_v15 = vpop.xlane.xlu1 %165 }
 0x147   : > { %353 = vlog2.f32 %v166_v15 }
 0x14a   : > { %v172_v16 = vpop.xlane.xlu1 %171 }
 0x14e   : > { %v183_v20 = vpop.xlane.xlu1 %182 }
 0x151   : > { %v354_v17 = vpop.eup %353 }
 0x152   : > { %v168_v18 = vmul.f32 0.6931472, %v354_v17 }
 0x154   : > { %v169_v19 = vadd.f32 %v168_v18, %v160_v4 }
 0x156   : > { %v185_v22 = vmul.f32 16.0, %v169_v19  ;;  %v184_v25 = vsub.f32 %v183_v20, %v169_v19 }
 0x158   : > { %v186_v24 = vsub.f32 %v172_v16, %v185_v22  ;;  %v187_v28 = vmul.f32 -0.9, %v184_v25 }
 0x15a   : > { %v188_v27 = vsub.f32 %v186_v24, %v184_v25 }
 0x15c   : > { %v189_v29 = vmul.f32 0.006666667, %v188_v27 }
 0x15e   : > { %v190_v30 = vsub.f32 %v187_v28, %v189_v29 }
 0x160   : > { %v197_v31 = vsel %vm196_vm2, %v190_v30, 0.0 }
 0x161   : > { %v199_v32 = vsel %vm198_vm3, %v197_v31, 0.0 }
 0x162   : > { %200 = vadd.xlane.f32.xlu1 %v199_v32 }
 0x1ef   : > { %v201_v33 = vpop.xlane.xlu1 %200 }
 0x1f0   : > { %v202_v34 = vrot.slane %v201_v33, 4 }
 0x1f2   : > { %v203_v35 = vadd.f32 %v202_v34, %v201_v33 }
 0x1f4   : > { %v204_v36 = vrot.slane %v203_v35, 2 }
 0x1f6   : > { %v205_v37 = vadd.f32 %v204_v36, %v203_v35 }
 0x1f8   : > { %v206_v38 = vrot.slane %v205_v37, 1 }
 0x1fa   : > { %v207_v39 = vadd.f32 %v206_v38, %v205_v37 }
 0x1fc   : > { %308 = vpush %v207_v39 }
 0x22d   : > { %s309_s7 = spop %308 }
 0x22e   : > { %v209_v40 = vstv %s309_s7 }
 0x22f   : > { %210 = vst [vmem:[%s147_s4] sm:$0xff] %v209_v40 }
 0x230   : > { %368 = shalt.err (!%p365_p3)
}
 0x231   : > { %s369_s24 = scalar_lea.hbm %s504_s16, 128  ;;  %s373_s27 = scalar_lea.hbm %s546_s2, 384 }
 0x232   : > { %p370_p4 = scmp.ne.s32.totalorder %s504_s16, %s369_s24  ;;  %p374_p9 = scmp.lt.u32.totalorder %s504_s16, %s546_s2 }
 0x233   : > { %p375_p10 = scmp.lt.u32.totalorder %s373_s27, %s369_s24  ;;  %p377_p12 = scmp.lt.u32.totalorder %s369_s24, %s504_s16 }
 0x234   : > { %p371_p7 = pnand %p370_p4, %p474_p5 }
 0x235   : > { %p376_p11 = por %p375_p10, %p374_p9 }
 0x236   : > { %p372_p8 = pneg %p371_p7 }
 0x237   : > { %p378_p13 = por %p377_p12, %p376_p11 }
 0x239   : > { %p379_p0 = pnand %p378_p13, %p372_p8 }
 0x23b   : > { %382 = shalt.err (!%p379_p0)
}
 0x23c   : > { %310 = dma.vmem_to_hbm [thread:$0]  (%p474_p5), %s499_s5, 128, %s504_s16, %s212_s17  }
 0x23d PF: > { %p316_p1 = scmp.ge.s32.totalorder %s417_s12, 2  ;;  %s237_s30 = sand.u32 1, %s405_s9  }
 0x23e   : > { %s238_s3 = scalar_lea.sflag [#allocation3], %s237_s30 }
 0x23f   : > { %p313_p2 = pnand %p316_p1, %p478_p6 }
 0x241   : > { %400 = dma.done.wait (!%p313_p2), %s238_s3, 128  }
 0x242   : > { %402 = vsyncadd (!%p313_p2), %s238_s3, 4294967168  ;;  %p12_p3 = scmp.ge.s32.totalorder %s461_s15, 5   ;;  %s549_s9 = smov %s409_s10 }
 0x243   : > { %s550_s10 = smov %s413_s11  ;;  %s551_s11 = smov %s472_s18 }
 0x244   : > { %s552_s12 = smov %s461_s15  ;;  %14 = sbr.rel (!%p12_p3) target bundleno = 3 (0x3), region = 66 }
 0x24b   :  { %243 = vsyncpa [#allocation3], 1 }
 0x24c   :  { %245 = vsyncpa [#allocation3 + $0x1], 1 }

</bundles_post_ra>
